<compile_context>
chip_gen: v6e
topology: v6e:2x2x1
jax: 0.10.0
libtpu: 0.0.40
codegen_flags: <defaults>
</compile_context>

<pallas_src>
from dataclasses import dataclass
from typing import Dict, List

import numpy as np
import jax
import jax.numpy as jnp
from jax.experimental import pallas as pl
from jax.experimental.pallas import tpu as pltpu

D_IN = 256        # small stand-in for the module default 768
D_HIDDEN = 128    # as in the module default
MXU_IN_DTYPE = jnp.float32   # set to jnp.bfloat16 for large, MXU-bound batches


# ----------------------------- tree node --------------------------------- #
class Node:
    def __init__(self, label: str, span: tuple, children: List["Node"] = None):
        self.label = label
        self.span = span
        self.children = children or []
        self.h = self.c = None

    def is_leaf(self) -> bool:
        return not self.children


# ----------------------------- host-side tables --------------------------- #
def _round_up(x: int, m: int) -> int:
    return ((x + m - 1) // m) * m


@dataclass
class ForestTables:
    nodes: List[Node]
    num_levels: int     # level 0 = leaves, levels 1..L-1 = internal heights
    n_leaf_pad: int
    n_max: int          # padded max internal nodes per level
    n_pad: int          # total state rows = n_leaf_pad + (num_levels-1)*n_max
    X: np.ndarray         # (n_leaf_pad, D_IN)  leaf embeddings (0 for missing/pad)
    leaf_mask: np.ndarray  # (n_leaf_pad, 1)    1.0 for present-token leaves
    A_sum: np.ndarray     # (L, n_max, n_pad)   child-SUM gather matrix per level
    inv_cnt: np.ndarray   # (L, n_max, 1)       1/child_count per slot (1.0 for pad)


def build_forest_tables(roots: List[Node], vec_lookup: Dict[int, jnp.ndarray],
                        d_in: int = D_IN) -> ForestTables:
    nodes: List[Node] = []

    def collect(n: Node):
        nodes.append(n)
        for ch in n.children:
            collect(ch)

    for r in roots:
        collect(r)

    # heights (leaf = 0); internal nodes grouped by height = grid level
    memo = {}

    def height(n: Node) -> int:
        k = id(n)
        if k not in memo:
            memo[k] = 0 if n.is_leaf() else 1 + max(height(c) for c in n.children)
        return memo[k]

    leaves = [n for n in nodes if n.is_leaf()]
    internal_levels: Dict[int, List[Node]] = {}
    for n in nodes:
        if not n.is_leaf():
            internal_levels.setdefault(height(n), []).append(n)

    max_h = max(internal_levels) if internal_levels else 0
    num_levels = max_h + 1
    n_leaf_pad = _round_up(max(len(leaves), 1), 8)
    n_max = _round_up(max((len(v) for v in internal_levels.values()), default=1), 8)
    n_pad = n_leaf_pad + (num_levels - 1) * n_max

    # level-contiguous node numbering: leaves first, then each internal level gets a
    # dedicated n_max-row block -> per-level scatter becomes one contiguous pl.ds store.
    for i, n in enumerate(leaves):
        n._nid = i
    for lvl, group in internal_levels.items():
        base = n_leaf_pad + (lvl - 1) * n_max
        for s, n in enumerate(group):
            n._nid = base + s

    X = np.zeros((n_leaf_pad, d_in), np.float32)
    leaf_mask = np.zeros((n_leaf_pad, 1), np.float32)
    A_sum = np.zeros((num_levels, n_max, n_pad), np.float32)
    inv_cnt = np.ones((num_levels, n_max, 1), np.float32)   # 1.0 on pad slots -> no inf/nan

    for n in leaves:
        tok = n.span[0]
        if tok in vec_lookup:                    # missing token -> h = 0 (mask stays 0)
            X[n._nid] = np.asarray(vec_lookup[tok], np.float32)
            leaf_mask[n._nid, 0] = 1.0

    for lvl, group in internal_levels.items():
        for s, n in enumerate(group):
            cnt = len(n.children)
            inv_cnt[lvl, s, 0] = 1.0 / cnt
            for ch in n.children:
                A_sum[lvl, s, ch._nid] += 1.0

    return ForestTables(nodes, num_levels, n_leaf_pad, n_max, n_pad,
                        X, leaf_mask, A_sum, inv_cnt)


# ----------------------------- the single Pallas kernel ------------------- #
def make_tree_lstm_kernel(n_leaf_pad: int, n_max: int):
    H = D_HIDDEN

    def kernel(x_ref, bias_ref, w_in_ref, w_up_ref, b_up_ref,
               a_sum_ref, inv_cnt_ref, state_ref):
        lvl = pl.program_id(0)

        # ---- level 0: zero the whole [h | c] slab, then project all leaves in one matmul ----
        @pl.when(lvl == 0)
        def _leaves():
            state_ref[...] = jnp.zeros_like(state_ref)
            h_leaf = jnp.dot(x_ref[...].astype(MXU_IN_DTYPE), w_in_ref[...],
                             preferred_element_type=jnp.float32) + bias_ref[...]
            state_ref[0:n_leaf_pad, 0:H] = h_leaf

        # ---- levels 1..L-1: fused gather -> gates -> contiguous store into this level's rows ----
        @pl.when(lvl > 0)
        def _internal():
            # one 256-lane gather: rows = level slots, cols = [sum_h | sum_c]
            gathered = jnp.dot(a_sum_ref[...], state_ref[...],
                               preferred_element_type=jnp.float32)
            h_avg = gathered[:, 0:H] * inv_cnt_ref[...]        # child mean for h
            c_sum = gathered[:, H:2 * H]                       # child sum for c
            gates = jnp.dot(h_avg.astype(MXU_IN_DTYPE), w_up_ref[...],
                            preferred_element_type=jnp.float32) + b_up_ref[...]
            # columns pre-permuted host-side to [i | o | f | u]: one wide sigmoid + one tanh
            sig = jax.nn.sigmoid(gates[:, 0:3 * H])
            i_g = sig[:, 0 * H:1 * H]
            o_g = sig[:, 1 * H:2 * H]
            f_g = sig[:, 2 * H:3 * H]
            u_g = jnp.tanh(gates[:, 3 * H:4 * H])
            # sum_j(f * c_j) == f * sum_j(c_j): f shared across children (matches module)
            c_new = i_g * u_g + f_g * c_sum
            h_new = o_g * jnp.tanh(c_new)
            # level-contiguous row block -> single aligned store, no scatter matmul
            off = pl.multiple_of(n_leaf_pad + (lvl - 1) * n_max, 8)
            state_ref[pl.ds(off, n_max), :] = jnp.concatenate([h_new, c_new], axis=1)

    return kernel


# ----------------------------- driver -------------------------------------- #
def pallas_forest_forward(roots, vec_lookup, W_in, b_in, W_up, b_up):
    """Runs the Child-Sum Tree-LSTM over every tree in `roots` with ONE pallas_call.
    Fills node.h / node.c (numpy rows of one contiguous slab) for all nodes."""
    tbl = build_forest_tables(roots, vec_lookup)
    H = D_HIDDEN
    n_leaf_pad, n_max, n_pad, n_lvl = tbl.n_leaf_pad, tbl.n_max, tbl.n_pad, tbl.num_levels

    # kernel-friendly parameter forms
    w_in_t = jnp.asarray(np.asarray(W_in).T, MXU_IN_DTYPE)                 # (D_IN, H)
    # leaf mask baked into the bias slab: present leaf -> b_in, missing/pad -> 0
    bias_leaf = jnp.asarray(tbl.leaf_mask * np.asarray(b_in).reshape(1, H), jnp.float32)
    # permute W_update output columns from [i, o, u, f] -> [i, o, f, u] so the three
    # sigmoid gates are contiguous (one wide sigmoid in-kernel).
    perm = np.concatenate([np.arange(0, H), np.arange(H, 2 * H),
                           np.arange(3 * H, 4 * H), np.arange(2 * H, 3 * H)])
    w_up_t = jnp.asarray(np.asarray(W_up)[perm].T, MXU_IN_DTYPE)           # (H, 4H)
    b_up_row = jnp.asarray(np.asarray(b_up)[perm].reshape(1, 4 * H), jnp.float32)

    kernel = make_tree_lstm_kernel(n_leaf_pad, n_max)

    def const2d(shape):
        return pl.BlockSpec(shape, lambda l: (0, 0))        # VMEM-resident across levels

    state = pl.pallas_call(
        kernel,
        out_shape=jax.ShapeDtypeStruct((n_pad, 2 * H), jnp.float32),   # [h | c] slab
        grid=(n_lvl,),
        in_specs=[
            const2d((n_leaf_pad, D_IN)),                                 # X (leaf rows only)
            const2d((n_leaf_pad, H)),                                    # masked leaf bias
            const2d((D_IN, H)),                                          # W_in^T
            const2d((H, 4 * H)),                                         # W_update^T (permuted)
            const2d((1, 4 * H)),                                         # b_update   (permuted)
            pl.BlockSpec((None, n_max, n_pad), lambda l: (l, 0, 0)),     # A_sum[l]
            pl.BlockSpec((None, n_max, 1), lambda l: (l, 0, 0)),         # 1/child_count[l]
        ],
        out_specs=pl.BlockSpec((n_pad, 2 * H), lambda l: (0, 0)),        # persistent accumulator
        compiler_params=pltpu.CompilerParams(dimension_semantics=("arbitrary",)),
    )(jnp.asarray(tbl.X), bias_leaf, w_in_t, w_up_t, b_up_row,
      jnp.asarray(tbl.A_sum), jnp.asarray(tbl.inv_cnt))

    jax.block_until_ready(state)
    state_np = np.asarray(state)
    h_np, c_np = state_np[:, :H], state_np[:, H:]
    for n in tbl.nodes:                 # one host-side numpy view; no per-node XLA slices
        n.h, n.c = h_np[n._nid], c_np[n._nid]
    return h_np, c_np


# ----------------------------- pure-JAX reference ------------------------- #
def ref_forward(node, vec_lookup, W_in, b_in, W_up, b_up):
    if node.is_leaf():
        idx = node.span[0]
        if idx not in vec_lookup:
            h = jnp.zeros((D_HIDDEN,), jnp.float32)
        else:
            h = vec_lookup[idx] @ W_in.T + b_in
        return h, jnp.zeros_like(h)
    child = [ref_forward(c, vec_lookup, W_in, b_in, W_up, b_up) for c in node.children]
    h_children = jnp.stack([h for h, _ in child])
    c_children = jnp.stack([c for _, c in child])
    h_avg = jnp.mean(h_children, axis=0)
    gates = h_avg @ W_up.T + b_up
    i, o, u, f = jnp.split(gates, 4, axis=-1)
    i = jax.nn.sigmoid(i)
    o = jax.nn.sigmoid(o)
    u = jnp.tanh(u)
    f = jax.nn.sigmoid(f)[None, :]
    c = i * u + jnp.sum(f * c_children, axis=0)
    h = o * jnp.tanh(c)
    return h, c


# --------------------------------- main ----------------------------------- #
if __name__ == "__main__":
    key = jax.random.PRNGKey(0)
    k_emb, k_win, k_bin, k_wup, k_bup = jax.random.split(key, 5)

    T = 8  # sequence length (tokens)
    embeddings = jax.random.normal(k_emb, (T, D_IN), jnp.float32)
    # token 5 deliberately missing to exercise the zero-fallback leaf path
    vec_lookup = {i: embeddings[i] for i in range(T) if i != 5}

    # parameters (same shapes as nn.Linear(d_in,128) / nn.Linear(128,512))
    W_in = 0.05 * jax.random.normal(k_win, (D_HIDDEN, D_IN), jnp.float32)
    b_in = 0.05 * jax.random.normal(k_bin, (D_HIDDEN,), jnp.float32)
    W_up = 0.05 * jax.random.normal(k_wup, (4 * D_HIDDEN, D_HIDDEN), jnp.float32)
    b_up = 0.05 * jax.random.normal(k_bup, (4 * D_HIDDEN,), jnp.float32)

    # tree 1: small deterministic constituency-style tree over tokens 0..7
    lv = [Node(f"t{i}", (i, i)) for i in range(T)]
    n01 = Node("NP", (0, 1), [lv[0], lv[1]])
    n23 = Node("VP", (2, 3), [lv[2], lv[3]])
    n0123 = Node("S1", (0, 3), [n01, n23])
    n456 = Node("NP2", (4, 6), [lv[4], lv[5], lv[6]])
    n4567 = Node("VP2", (4, 7), [n456, lv[7]])
    root1 = Node("S", (0, 7), [n0123, n4567])

    # tree 2: a second sentence, batched into the SAME single pallas_call
    lw = [Node(f"s{i}", (i, i)) for i in range(3)]
    m12 = Node("NP", (1, 2), [lw[1], lw[2]])
    root2 = Node("S", (0, 2), [lw[0], m12])

    h_all, c_all = pallas_forest_forward([root1, root2], vec_lookup, W_in, b_in, W_up, b_up)

    for root in (root1, root2):
        h_ref, c_ref = ref_forward(root, vec_lookup, W_in, b_in, W_up, b_up)
        assert root.h.shape == (D_HIDDEN,) and root.c.shape == (D_HIDDEN,)
        assert np.allclose(root.h, np.asarray(h_ref), atol=1e-4, rtol=1e-4), "h mismatch vs reference"
        assert np.allclose(root.c, np.asarray(c_ref), atol=1e-4, rtol=1e-4), "c mismatch vs reference"
    # also check an intermediate node to exercise the fused-state / contiguous-store path
    h_mid, c_mid = ref_forward(n0123, vec_lookup, W_in, b_in, W_up, b_up)
    assert np.allclose(n0123.h, np.asarray(h_mid), atol=1e-4, rtol=1e-4)
    assert np.allclose(n0123.c, np.asarray(c_mid), atol=1e-4, rtol=1e-4)

    print("KERNEL_OK")
</pallas_src>

<mosaic_0001>
module attributes {stable_mosaic.version = 11 : i64} {
  func.func @kernel(%arg0: i32, %arg1: memref<16x256xf32, #tpu.memory_space<vmem>>, %arg2: memref<16x128xf32, #tpu.memory_space<vmem>>, %arg3: memref<256x128xf32, #tpu.memory_space<vmem>>, %arg4: memref<128x512xf32, #tpu.memory_space<vmem>>, %arg5: memref<1x512xf32, #tpu.memory_space<vmem>>, %arg6: memref<1x8x40xf32, #tpu.memory_space<vmem>>, %arg7: memref<1x8x1xf32, #tpu.memory_space<vmem>>, %arg8: memref<40x256xf32, #tpu.memory_space<vmem>>) attributes {dimension_semantics = [#tpu.dimension_semantics<arbitrary>], iteration_bounds = array<i64: 4>, scalar_prefetch = 0 : i64, scratch_operands = 0 : i64, tpu.core_type = #tpu.core_type<tc>, window_params = [{pipeline_mode = #tpu.pipeline_mode<synchronous>, transform_indices = @transform_0, window_bounds = array<i64: 16, 256>}, {pipeline_mode = #tpu.pipeline_mode<synchronous>, transform_indices = @transform_1, window_bounds = array<i64: 16, 128>}, {pipeline_mode = #tpu.pipeline_mode<synchronous>, transform_indices = @transform_2, window_bounds = array<i64: 256, 128>}, {pipeline_mode = #tpu.pipeline_mode<synchronous>, transform_indices = @transform_3, window_bounds = array<i64: 128, 512>}, {pipeline_mode = #tpu.pipeline_mode<synchronous>, transform_indices = @transform_4, window_bounds = array<i64: 1, 512>}, {transform_indices = @transform_5, window_bounds = array<i64: 1, 8, 40>}, {transform_indices = @transform_6, window_bounds = array<i64: 1, 8, 1>}, {pipeline_mode = #tpu.pipeline_mode<synchronous>, transform_indices = @transform_7, window_bounds = array<i64: 40, 256>}]} {
    %c0_i32 = arith.constant 0 : i32
    %0 = arith.cmpi eq, %arg0, %c0_i32 : i32
    %1 = arith.extui %0 : i1 to i32
    %c0_i32_0 = arith.constant 0 : i32
    %2 = arith.cmpi ne, %1, %c0_i32_0 : i32
    scf.if %2 {
      %cst = arith.constant 0.000000e+00 : f32
      %6 = vector.broadcast %cst : f32 to vector<40x256xf32>
      %c0 = arith.constant 0 : index
      %c0_3 = arith.constant 0 : index
      %7 = vector.load %arg8[%c0, %c0_3] : memref<40x256xf32, #tpu.memory_space<vmem>>, vector<40x256xf32>
      tpu.vector_store %arg8[%c0, %c0_3], %6 {strides = array<i32>} : memref<40x256xf32, #tpu.memory_space<vmem>>, vector<40x256xf32>,
      %c0_4 = arith.constant 0 : index
      %c0_5 = arith.constant 0 : index
      %8 = vector.load %arg1[%c0_4, %c0_5] : memref<16x256xf32, #tpu.memory_space<vmem>>, vector<16x256xf32>
      %c0_6 = arith.constant 0 : index
      %c0_7 = arith.constant 0 : index
      %9 = vector.load %arg3[%c0_6, %c0_7] : memref<256x128xf32, #tpu.memory_space<vmem>>, vector<256x128xf32>
      %cst_8 = arith.constant dense<0.000000e+00> : vector<16x128xf32>
      %10 = tpu.matmul %8, %9, %cst_8 {dimension_numbers = #tpu.dot_dimension_numbers<[1], [0], [0], [1], [0, 0, 1, 1], [], []>} : vector<16x256xf32>, vector<256x128xf32>, vector<16x128xf32> -> vector<16x128xf32>
      %c0_9 = arith.constant 0 : index
      %c0_10 = arith.constant 0 : index
      %11 = vector.load %arg2[%c0_9, %c0_10] : memref<16x128xf32, #tpu.memory_space<vmem>>, vector<16x128xf32>
      %12 = arith.addf %10, %11 : vector<16x128xf32>
      %c0_11 = arith.constant 0 : index
      %c0_12 = arith.constant 0 : index
      %13 = vector.load %arg8[%c0_11, %c0_12] : memref<40x256xf32, #tpu.memory_space<vmem>>, vector<16x128xf32>
      tpu.vector_store %arg8[%c0_11, %c0_12], %12 {strides = array<i32>} : memref<40x256xf32, #tpu.memory_space<vmem>>, vector<16x128xf32>,
    } else {
    }
    %c0_i32_1 = arith.constant 0 : i32
    %3 = arith.cmpi sgt, %arg0, %c0_i32_1 : i32
    %4 = arith.extui %3 : i1 to i32
    %c0_i32_2 = arith.constant 0 : i32
    %5 = arith.cmpi ne, %4, %c0_i32_2 : i32
    scf.if %5 {
      %c0 = arith.constant 0 : index
      %c0_3 = arith.constant 0 : index
      %c0_4 = arith.constant 0 : index
      %6 = vector.load %arg6[%c0, %c0_3, %c0_4] : memref<1x8x40xf32, #tpu.memory_space<vmem>>, vector<1x8x40xf32>
      %7 = vector.shape_cast %6 : vector<1x8x40xf32> to vector<8x40xf32>
      %c0_5 = arith.constant 0 : index
      %c0_6 = arith.constant 0 : index
      %8 = vector.load %arg8[%c0_5, %c0_6] : memref<40x256xf32, #tpu.memory_space<vmem>>, vector<40x256xf32>
      %cst = arith.constant dense<0.000000e+00> : vector<8x256xf32>
      %9 = tpu.matmul %7, %8, %cst {dimension_numbers = #tpu.dot_dimension_numbers<[1], [0], [0], [1], [0, 0, 1, 1], [], []>} : vector<8x40xf32>, vector<40x256xf32>, vector<8x256xf32> -> vector<8x256xf32>
      %10 = vector.extract_strided_slice %9 {offsets = [0, 0], sizes = [8, 128], strides = [1, 1]} : vector<8x256xf32> to vector<8x128xf32>
      %c0_7 = arith.constant 0 : index
      %c0_8 = arith.constant 0 : index
      %c0_9 = arith.constant 0 : index
      %11 = vector.load %arg7[%c0_7, %c0_8, %c0_9] : memref<1x8x1xf32, #tpu.memory_space<vmem>>, vector<1x8x1xf32>
      %12 = vector.shape_cast %11 : vector<1x8x1xf32> to vector<8x1xf32>
      %13 = vector.broadcast %12 : vector<8x1xf32> to vector<8x128xf32>
      %14 = arith.mulf %10, %13 : vector<8x128xf32>
      %15 = vector.extract_strided_slice %9 {offsets = [0, 128], sizes = [8, 128], strides = [1, 1]} : vector<8x256xf32> to vector<8x128xf32>
      %c0_10 = arith.constant 0 : index
      %c0_11 = arith.constant 0 : index
      %16 = vector.load %arg4[%c0_10, %c0_11] : memref<128x512xf32, #tpu.memory_space<vmem>>, vector<128x512xf32>
      %cst_12 = arith.constant dense<0.000000e+00> : vector<8x512xf32>
      %17 = tpu.matmul %14, %16, %cst_12 {dimension_numbers = #tpu.dot_dimension_numbers<[1], [0], [0], [1], [0, 0, 1, 1], [], []>} : vector<8x128xf32>, vector<128x512xf32>, vector<8x512xf32> -> vector<8x512xf32>
      %c0_13 = arith.constant 0 : index
      %c0_14 = arith.constant 0 : index
      %18 = vector.load %arg5[%c0_13, %c0_14] : memref<1x512xf32, #tpu.memory_space<vmem>>, vector<1x512xf32>
      %19 = vector.broadcast %18 : vector<1x512xf32> to vector<8x512xf32>
      %20 = arith.addf %17, %19 : vector<8x512xf32>
      %21 = vector.extract_strided_slice %20 {offsets = [0, 0], sizes = [8, 384], strides = [1, 1]} : vector<8x512xf32> to vector<8x384xf32>
      %22 = arith.negf %21 : vector<8x384xf32>
      %23 = math.exp %22 : vector<8x384xf32>
      %cst_15 = arith.constant 1.000000e+00 : f32
      %24 = vector.broadcast %cst_15 : f32 to vector<8x384xf32>
      %25 = arith.addf %24, %23 : vector<8x384xf32>
      %26 = arith.divf %24, %25 : vector<8x384xf32>
      %27 = vector.extract_strided_slice %26 {offsets = [0, 0], sizes = [8, 128], strides = [1, 1]} : vector<8x384xf32> to vector<8x128xf32>
      %28 = vector.extract_strided_slice %26 {offsets = [0, 128], sizes = [8, 128], strides = [1, 1]} : vector<8x384xf32> to vector<8x128xf32>
      %29 = vector.extract_strided_slice %26 {offsets = [0, 256], sizes = [8, 128], strides = [1, 1]} : vector<8x384xf32> to vector<8x128xf32>
      %30 = vector.extract_strided_slice %20 {offsets = [0, 384], sizes = [8, 128], strides = [1, 1]} : vector<8x512xf32> to vector<8x128xf32>
      %31 = math.tanh %30 : vector<8x128xf32>
      %32 = arith.mulf %27, %31 : vector<8x128xf32>
      %33 = arith.mulf %29, %15 : vector<8x128xf32>
      %34 = arith.addf %32, %33 : vector<8x128xf32>
      %35 = math.tanh %34 : vector<8x128xf32>
      %36 = arith.mulf %28, %35 : vector<8x128xf32>
      %c1_i32 = arith.constant 1 : i32
      %37 = arith.subi %arg0, %c1_i32 : i32
      %c8_i32 = arith.constant 8 : i32
      %38 = arith.muli %37, %c8_i32 : i32
      %c16_i32 = arith.constant 16 : i32
      %39 = arith.addi %c16_i32, %38 : i32
      %40 = tpu.assume_multiple %39, 8 : i32
      %41 = tpu.concatenate %36, %34 in 1 : vector<8x128xf32>, vector<8x128xf32> -> vector<8x256xf32>
      %42 = arith.index_cast %40 : i32 to index
      %c0_16 = arith.constant 0 : index
      %43 = vector.load %arg8[%42, %c0_16] : memref<40x256xf32, #tpu.memory_space<vmem>>, vector<8x256xf32>
      tpu.vector_store %arg8[%42, %c0_16], %41 {strides = array<i32>} : memref<40x256xf32, #tpu.memory_space<vmem>>, vector<8x256xf32>,
    } else {
    }
    return
  }
  func.func @transform_0(%arg0: i32) -> (i32, i32) {
    %c0_i32 = arith.constant 0 : i32
    %c0_i32_0 = arith.constant 0 : i32
    %c0_i32_1 = arith.constant 0 : i32
    return %c0_i32, %c0_i32_0 : i32, i32
  }
  func.func @transform_1(%arg0: i32) -> (i32, i32) {
    %c0_i32 = arith.constant 0 : i32
    %c0_i32_0 = arith.constant 0 : i32
    %c0_i32_1 = arith.constant 0 : i32
    return %c0_i32, %c0_i32_0 : i32, i32
  }
  func.func @transform_2(%arg0: i32) -> (i32, i32) {
    %c0_i32 = arith.constant 0 : i32
    %c0_i32_0 = arith.constant 0 : i32
    %c0_i32_1 = arith.constant 0 : i32
    return %c0_i32, %c0_i32_0 : i32, i32
  }
  func.func @transform_3(%arg0: i32) -> (i32, i32) {
    %c0_i32 = arith.constant 0 : i32
    %c0_i32_0 = arith.constant 0 : i32
    %c0_i32_1 = arith.constant 0 : i32
    return %c0_i32, %c0_i32_0 : i32, i32
  }
  func.func @transform_4(%arg0: i32) -> (i32, i32) {
    %c0_i32 = arith.constant 0 : i32
    %c0_i32_0 = arith.constant 0 : i32
    %c0_i32_1 = arith.constant 0 : i32
    return %c0_i32, %c0_i32_0 : i32, i32
  }
  func.func @transform_5(%arg0: i32) -> (i32, i32, i32) {
    %c0_i32 = arith.constant 0 : i32
    %c0_i32_0 = arith.constant 0 : i32
    %c0_i32_1 = arith.constant 0 : i32
    return %arg0, %c0_i32, %c0_i32_0 : i32, i32, i32
  }
  func.func @transform_6(%arg0: i32) -> (i32, i32, i32) {
    %c0_i32 = arith.constant 0 : i32
    %c0_i32_0 = arith.constant 0 : i32
    %c0_i32_1 = arith.constant 0 : i32
    return %arg0, %c0_i32, %c0_i32_0 : i32, i32, i32
  }
  func.func @transform_7(%arg0: i32) -> (i32, i32) {
    %c0_i32 = arith.constant 0 : i32
    %c0_i32_0 = arith.constant 0 : i32
    %c0_i32_1 = arith.constant 0 : i32
    return %c0_i32, %c0_i32_0 : i32, i32
  }
}

</mosaic_0001>

<bundles_post_ra>
// kernel: tpu_custom_call.1
= control target key start
LH: loop header
LB: loop body
LE: loop exit
PB: predicated region body
PF: predicated region fallthrough
CT: control target
= control target key end

     0   :  { %12 = vsyncpa [#allocation3], 0  ;;  %s1552_s0 = inlined_call_operand.vmem [shape: f32[16,256], index: 0, kind: input, shape index: {}]   ;;  %s1553_s1 = inlined_call_operand.hbm [shape: f32[16,128], index: 1, kind: input, shape index: {}]   ;;  %s1554_s2 = inlined_call_operand.hbm [shape: f32[256,128], index: 2, kind: input, shape index: {}]   ;;  %s1555_s3 = inlined_call_operand.hbm [shape: f32[128,512], index: 3, kind: input, shape index: {}]   ;;  %s1556_s4 = inlined_call_operand.vmem [shape: f32[1,512], index: 4, kind: input, shape index: {}]   ;;  %s1557_s5 = inlined_call_operand.hbm [shape: f32[4,8,40], index: 5, kind: input, shape index: {}]   ;;  %s1558_s6 = inlined_call_operand.vmem [shape: f32[4,8,1], index: 6, kind: input, shape index: {}]   ;;  %s1559_s7 = inlined_call_operand.hbm [shape: f32[40,256], index: 7, kind: output, shape index: {}]  }
   0x1   :  { %13 = vsyncpa [#allocation6], 0 }
   0x2   :  { %14 = vsyncpa [#allocation9], 0 }
   0x3   :  { %16 = vsyncpa [#allocation9 + $0x1], 0 }
   0x4   :  { %17 = vsyncpa [#allocation4], 0  ;;  %s1369_s24 = smov 0   ;;  %s1371_s25 = smov 0  }
   0x5   :  { %s1373_s26 = smov 0   ;;  %s1375_s27 = smov 0  }
   0x6 LB: > { %s1388_s28 = sadd.s32 4294967295, %s1313_s27   ;;  %p148_p0 = scmp.ne.s32.totalorder %s1305_s25, %s1301_s24  ;;  %s1313_s27 = sphi %s1375_s27, %s1577_s27   ;;  %s1309_s26 = sphi %s1373_s26, %s1576_s26   ;;  %s1305_s25 = sphi %s1371_s25, %s1575_s25   ;;  %s1301_s24 = sphi %s1369_s24, %s1574_s24  }
   0x7   : > { %p1560_p1 = scmp.eq.s32.totalorder %s1388_s28, 0  ;;  %p936_p2 = scmp.ge.s32.totalorder %s1313_s27, 1 }
   0x8   : > { %p206_p3 = scmp.lt.s32.totalorder %s1313_s27, 5  ;;  %s1315_s8 = smov [#allocation5]  }
   0x9   : > { %p1397_p5 = por %p1560_p1, %p148_p0  ;;  %s234_s9 = sshll.u32 %s1315_s8, 4  ;;  %s235_s9 = int_to_ptr.vmem [resolvable:$true] %s234_s9 }
   0xa   : > { %p1401_p6 = pnand %p936_p2, %p206_p3  ;;  %s1316_s11 = smov [#allocation2]  }
   0xb   : > { %s1563_s29 = scalar_select %p1397_p5, 1, 0 }
   0xc   : > { %s1564_s30 = scalar_select %p1401_p6, 1, 0 }
   0xd   : > { %p1052_p7 = pneg %p1401_p6  ;;  %s221_s12 = sshll.u32 %s1316_s11, 4  ;;  %s222_s12 = int_to_ptr.vmem [resolvable:$true] %s221_s12 }
   0xe   : > { %s1317_s13 = smov [#allocation7]   ;;  %s1148_s15 = scalar_lea.vmem %s235_s9, 4096 }
   0xf   : > { %p1409_p8 = pnand %p1052_p7, %p1560_p1  ;;  %s247_s14 = sshll.u32 %s1317_s13, 4  ;;  %s248_s14 = int_to_ptr.vmem [resolvable:$true] %s247_s14 }
  0x10   : > { %p1149_p10 = scmp.ne.s32.totalorder %s235_s9, %s1148_s15  ;;  %p1156_p13 = scmp.lt.s32.totalorder %s235_s9, %s235_s9 }
  0x11   : > { %p1139_p9 = pneg %p1409_p8  ;;  %p1157_p0 = scmp.lt.s32.totalorder %s1148_s15, %s1148_s15 }
  0x13   : > { %p1151_p11 = pnand %p1149_p10, %p1139_p9  ;;  %p1158_p2 = por %p1157_p0, %p1156_p13 }
  0x15   : > { %p1152_p12 = pneg %p1151_p11 }
  0x17   : > { %p1159_p3 = pnand %p1158_p2, %p1152_p12 }
  0x19   : > { %1162 = shalt.err (!%p1159_p3)
}
  0x1a   : > { %s1318_s16 = smov 128   ;;  %s1319_s17 = smov 8  }
  0x1b   : > { %1058 = dma.hbm_to_vmem [thread:$0]  (!%p1409_p8), %s1554_s2, 4096, %s235_s9, [#allocation6], %s1318_s16, %s1318_s16, %s1319_s17  }
  0x1c   : > { %s1174_s20 = scalar_lea.vmem %s222_s12, 256  ;;  %p1182_p4 = scmp.lt.s32.totalorder %s222_s12, %s222_s12 }
  0x1d   : > { %p1175_p7 = scmp.ne.s32.totalorder %s222_s12, %s1174_s20  ;;  %p1183_p1 = scmp.lt.s32.totalorder %s1174_s20, %s1174_s20 }
  0x1f   : > { %p1177_p10 = pnand %p1175_p7, %p1139_p9  ;;  %p1184_p13 = por %p1183_p1, %p1182_p4 }
  0x21   : > { %p1178_p11 = pneg %p1177_p10 }
  0x23   : > { %p1185_p12 = pnand %p1184_p13, %p1178_p11 }
  0x25   : > { %1188 = shalt.err (!%p1185_p12)
}
  0x26   : > { %1055 = dma.hbm_to_vmem [thread:$0]  (!%p1409_p8), %s1553_s1, 256, %s222_s12, [#allocation3], %s1318_s16, %s1318_s16, %s1319_s17  }
  0x27   : > { %s1200_s23 = scalar_lea.vmem %s248_s14, 8192  ;;  %p1208_p7 = scmp.lt.s32.totalorder %s248_s14, %s248_s14 }
  0x28   : > { %p1201_p0 = scmp.ne.s32.totalorder %s248_s14, %s1200_s23  ;;  %p1209_p10 = scmp.lt.s32.totalorder %s1200_s23, %s1200_s23 }
  0x2a   : > { %p1203_p2 = pnand %p1201_p0, %p1139_p9  ;;  %p1210_p5 = por %p1209_p10, %p1208_p7 }
  0x2c   : > { %p1204_p3 = pneg %p1203_p2 }
  0x2e   : > { %p1211_p1 = pnand %p1210_p5, %p1204_p3 }
  0x30   : > { %1214 = shalt.err (!%p1211_p1)
}
  0x31   : > { %s1320_s24 = smov 512   ;;  %s1321_s8 = smov 32  }
  0x32   : > { %1061 = dma.hbm_to_vmem [thread:$0]  (!%p1409_p8), %s1555_s3, 8192, %s248_s14, [#allocation6], %s1320_s24, %s1320_s24, %s1321_s8  }
  0x33   : > { %s1440_s12 = sadd.s32 1, %s1313_s27   ;;  %s135_s15 = sadd.s32 1, %s1309_s26 }
  0x34   : > { %s132_s13 = ssub.s32 %s1313_s27, %s1440_s12  ;;  %p142_p5 = scmp.ne.s32.totalorder %s1309_s26, %s1305_s25 }
  0x35   : > { %p133_p4 = scmp.eq.s32.totalorder %s132_s13, 0  ;;  %p143_p9 = scmp.eq.s32.totalorder %s1313_s27, 0 }
  0x36   : > { %p1069_p11 = scmp.lt.s32.totalorder %s1313_s27, 4  ;;  %s264_s17 = sand.u32 1, %s1309_s26  }
  0x37   : > { %s1450_s16 = scalar_select %p133_p4, %s1309_s26, %s135_s15  }
  0x38   : > { %p144_p13 = por %p143_p9, %p142_p5  ;;  %s941_s18 = sshll.u32 %s264_s17, 3 }
  0x39   : > { %s942_s19 = sshll.u32 %s1313_s27, 7  ;;  %s268_s14 = scalar_lea.vmem [#allocation8], %s941_s18 }
  0x3a   : > { %s1457_s21 = scalar_lea.hbm %s1557_s5, %s942_s19  ;;  %s275_s22 = sshll.u32 %s268_s14, 4  ;;  %s276_s22 = int_to_ptr.vmem [resolvable:$true] %s275_s22 }
  0x3b   : > { %p1459_p8 = pnand %p1069_p11, %p144_p13  ;;  %s265_s24 = scalar_lea.sflag [#allocation9], %s264_s17 }
  0x3c   : > { %s1215_s8 = scalar_lea.hbm %s1457_s21, 128  ;;  %s1220_s11 = scalar_lea.hbm %s1557_s5, 512 }
  0x3d   : > { %p1216_p12 = scmp.ne.s32.totalorder %s1457_s21, %s1215_s8  ;;  %p1217_p0 = pneg %p1459_p8 }
  0x3e   : > { %p1221_p7 = scmp.lt.s32.totalorder %s1457_s21, %s1557_s5  ;;  %p1222_p10 = scmp.lt.s32.totalorder %s1220_s11, %s1215_s8 }
  0x3f   : > { %p1218_p2 = pnand %p1217_p0, %p1216_p12 }
  0x40   : > { %p1223_p1 = por %p1222_p10, %p1221_p7 }
  0x41   : > { %p1219_p3 = pneg %p1218_p2 }
  0x43   : > { %p1224_p4 = pnand %p1223_p1, %p1219_p3 }
  0x45   : > { %1227 = shalt.err (!%p1224_p4)
}
  0x46   : > { %s1228_s18 = scalar_lea.vmem %s276_s22, 128  ;;  %s1322_s17 = smov [#allocation8]  }
  0x47   : > { %p1229_p5 = scmp.ne.s32.totalorder %s276_s22, %s1228_s18  ;;  %s1233_s19 = sshll.u32 %s1322_s17, 4  ;;  %s1234_s19 = int_to_ptr.vmem [resolvable:$false] %s1233_s19 }
  0x48   : > { %s1235_s10 = scalar_lea.vmem %s1234_s19, 256  ;;  %p1236_p13 = scmp.lt.s32.totalorder %s276_s22, %s1234_s19 }
  0x49   : > { %p1231_p9 = pnand %p1229_p5, %p1217_p0  ;;  %p1237_p12 = scmp.lt.s32.totalorder %s1235_s10, %s1228_s18 }
  0x4b   : > { %p1232_p11 = pneg %p1231_p9  ;;  %p1238_p2 = por %p1237_p12, %p1236_p13 }
  0x4d   : > { %p1239_p6 = pnand %p1238_p2, %p1232_p11 }
  0x4f   : > { %1242 = shalt.err (!%p1239_p6)
}
  0x50   : > { %1065 = dma.hbm_to_vmem [thread:$0]  (!%p1459_p8), %s1457_s21, 128, %s276_s22, %s265_s24  }
  0x51   : > { %p1567_p3 = scmp.ne.s32.totalorder %s1564_s30, 0 }
  0x52   : > { %p1568_p7 = scmp.eq.s32.totalorder (!%p1567_p3), %s1388_s28, 0 }
  0x53   : > { %291 = sbr.rel (%p1567_p3) target bundleno = 817 (0x331), region = 48 }
  0x58   : > { %1284 = dma.done.wait (%p1568_p7), [#allocation3], 256   ;;  %p1569_p0 = pmov %p1568_p7 }
  0x5a   : > { %1286 = vsyncadd (%p1569_p0), [#allocation3], 4294967040  ;;  %p1570_p10 = pmov %p1569_p0 }
  0x5b   : > { %p1571_p1 = pmov %p1569_p0 }
  0x5c   : > { %1288 = dma.done.wait (%p1570_p10), [#allocation6], 12288  }
  0x5d   : > { %1290 = vsyncadd (%p1571_p1), [#allocation6], 4294955008  ;;  %s305_s20 = sand.u32 1, %s1305_s25   ;;  %p1572_p6 = scmp.ne.s32.totalorder %s1563_s29, 0 }
  0x5e   : > { %s1488_s14 = sshll.u32 %s305_s20, 3  ;;  %s306_s30 = scalar_lea.sflag [#allocation9], %s305_s20 }
  0x5f   : > { %s309_s21 = scalar_lea.vmem [#allocation8], %s1488_s14 }
  0x60   : > { %1292 = dma.done.wait (%p1572_p6), %s306_s30, 128  }
  0x61   : > { %1294 = vsyncadd (%p1572_p6), %s306_s30, 4294967168  ;;  %p339_p8 = scmp.lt.s32.totalorder %s1388_s28, 3  ;;  %p1573_p4 = scmp.ne.s32.totalorder %s1388_s28, 0 }
  0x63   : > { %s340_s22 = scalar_select %p339_p8, %s1388_s28, 3 }
  0x64   : > { %346 = sbr.rel (%p1573_p4) target bundleno = 339 (0x153), region = 68 }
  0x65   : > { %s948_s23 = sshll.u32 %s340_s22, 3 }
  0x66   : > { %s1500_s27 = scalar_lea.vmem %s1558_s6, %s948_s23 }
  0x69   : > { %v392_v0 = vld [vmem:[#allocation5 + $0xf8] sm:$0xff]  ;;  %v391_v2 = vld [vmem:[#allocation5 + $0xf0] sm:$0xff]  ;;  %v390_v4 = vld [vmem:[#allocation5 + $0xe8] sm:$0xff]  ;;  %v1323_v36 = vmov 0.0  }
  0x6a   : > { %v376_v1 = vld [vmem:[#allocation5 + $0x78] sm:$0xff]  ;;  %964 = vmatprep.subr.mxu0 %v392_v0  ;;  %1002 = vmatprep.subr.mxu1 %v392_v0  ;;  %v375_v3 = vld [vmem:[#allocation5 + $0x70] sm:$0xff]  ;;  %v374_v5 = vld [vmem:[#allocation5 + $0x68] sm:$0xff]  ;;  %348 = vst [vmem:[#allocation10 + $0x8] sm:$0xff] %v1323_v36 }
  0x6b   : > { %965 = vmatpush3.msra.mxu0 %v376_v1  ;;  %1018 = vmatpush3.msra.mxu1 %v376_v1  ;;  %v389_v6 = vld [vmem:[#allocation5 + $0xe0] sm:$0xff]  ;;  %v388_v8 = vld [vmem:[#allocation5 + $0xd8] sm:$0xff]  ;;  %v387_v10 = vld [vmem:[#allocation5 + $0xd0] sm:$0xff]  ;;  %350 = vst [vmem:[#allocation10 + $0x18] sm:$0xff] %v1323_v36 }
  0x6c   : > { %966 = vmatprep.subr.mxu0 %v391_v2  ;;  %1003 = vmatprep.subr.mxu1 %v391_v2  ;;  %v373_v7 = vld [vmem:[#allocation5 + $0x60] sm:$0xff]  ;;  %v372_v9 = vld [vmem:[#allocation5 + $0x58] sm:$0xff]  ;;  %v371_v11 = vld [vmem:[#allocation5 + $0x50] sm:$0xff]  ;;  %351 = vst [vmem:[#allocation10 + $0x20] sm:$0xff] %v1323_v36 }
  0x6d   : > { %967 = vmatpush3.msra.mxu0 %v375_v3  ;;  %1019 = vmatpush3.msra.mxu1 %v375_v3  ;;  %v386_v12 = vld [vmem:[#allocation5 + $0xc8] sm:$0xff]  ;;  %v385_v14 = vld [vmem:[#allocation5 + $0xc0] sm:$0xff]  ;;  %v384_v16 = vld [vmem:[#allocation5 + $0xb8] sm:$0xff]  ;;  %352 = vst [vmem:[#allocation10 + $0x28] sm:$0xff] %v1323_v36 }
  0x6e   : > { %968 = vmatprep.subr.mxu0 %v390_v4  ;;  %1004 = vmatprep.subr.mxu1 %v390_v4  ;;  %v370_v13 = vld [vmem:[#allocation5 + $0x48] sm:$0xff]  ;;  %v369_v15 = vld [vmem:[#allocation5 + $0x40] sm:$0xff]  ;;  %v368_v17 = vld [vmem:[#allocation5 + $0x38] sm:$0xff]  ;;  %353 = vst [vmem:[#allocation10 + $0x30] sm:$0xff] %v1323_v36 }
  0x6f   : > { %969 = vmatpush3.msra.mxu0 %v374_v5  ;;  %1020 = vmatpush3.msra.mxu1 %v374_v5  ;;  %v383_v18 = vld [vmem:[#allocation5 + $0xb0] sm:$0xff]  ;;  %v382_v20 = vld [vmem:[#allocation5 + $0xa8] sm:$0xff]  ;;  %v381_v22 = vld [vmem:[#allocation5 + $0xa0] sm:$0xff]  ;;  %354 = vst [vmem:[#allocation10 + $0x38] sm:$0xff] %v1323_v36 }
  0x70   : > { %970 = vmatprep.subr.mxu0 %v389_v6  ;;  %1005 = vmatprep.subr.mxu1 %v389_v6  ;;  %v367_v19 = vld [vmem:[#allocation5 + $0x30] sm:$0xff]  ;;  %v366_v21 = vld [vmem:[#allocation5 + $0x28] sm:$0xff]  ;;  %v365_v23 = vld [vmem:[#allocation5 + $0x20] sm:$0xff]  ;;  %355 = vst [vmem:[#allocation10 + $0x40] sm:$0xff] %v1323_v36 }
  0x71   : > { %971 = vmatpush3.msra.mxu0 %v373_v7  ;;  %1021 = vmatpush3.msra.mxu1 %v373_v7  ;;  %v380_v24 = vld [vmem:[#allocation5 + $0x98] sm:$0xff]  ;;  %v379_v26 = vld [vmem:[#allocation5 + $0x90] sm:$0xff]  ;;  %v378_v28 = vld [vmem:[#allocation5 + $0x88] sm:$0xff]  ;;  %356 = vst [vmem:[#allocation10 + $0x48] sm:$0xff] %v1323_v36 }
  0x72   : > { %972 = vmatprep.subr.mxu0 %v388_v8  ;;  %1006 = vmatprep.subr.mxu1 %v388_v8  ;;  %v364_v25 = vld [vmem:[#allocation5 + $0x18] sm:$0xff]  ;;  %v363_v27 = vld [vmem:[#allocation5 + $0x10] sm:$0xff]  ;;  %v362_v29 = vld [vmem:[#allocation5 + $0x8] sm:$0xff] }
  0x73   : > { %973 = vmatpush3.msra.mxu0 %v372_v9  ;;  %1022 = vmatpush3.msra.mxu1 %v372_v9  ;;  %v377_v30 = vld [vmem:[#allocation5 + $0x80] sm:$0xff]  ;;  %v358_v32 = vld [vmem:[%s1552_s0 + $0x8] sm:$0xff]  ;;  %v360_v33 = vld [vmem:[%s1552_s0 + $0x18] sm:$0xff] }
  0x74   : > { %974 = vmatprep.subr.mxu0 %v387_v10  ;;  %1007 = vmatprep.subr.mxu1 %v387_v10  ;;  %v361_v31 = vld [vmem:[#allocation5] sm:$0xff]  ;;  %v357_v34 = vld [vmem:[%s1552_s0] sm:$0xff]  ;;  %v394_v41 = vld [vmem:[#allocation2 + $0x8] sm:$0xff] }
  0x75   : > { %975 = vmatpush3.msra.mxu0 %v371_v11  ;;  %1023 = vmatpush3.msra.mxu1 %v371_v11  ;;  %v359_v35 = vld [vmem:[%s1552_s0 + $0x10] sm:$0xff]  ;;  %v393_v39 = vld [vmem:[#allocation2] sm:$0xff] }
  0x76   : > { %976 = vmatprep.subr.mxu0 %v386_v12  ;;  %1008 = vmatprep.subr.mxu1 %v386_v12 }
  0x77   : > { %977 = vmatpush3.msra.mxu0 %v370_v13  ;;  %1024 = vmatpush3.msra.mxu1 %v370_v13 }
  0x78   : > { %978 = vmatprep.subr.mxu0 %v385_v14  ;;  %1009 = vmatprep.subr.mxu1 %v385_v14 }
  0x79   : > { %979 = vmatpush3.msra.mxu0 %v369_v15  ;;  %1025 = vmatpush3.msra.mxu1 %v369_v15 }
  0x7a   : > { %980 = vmatprep.subr.mxu0 %v384_v16  ;;  %1010 = vmatprep.subr.mxu1 %v384_v16 }
  0x7b   : > { %981 = vmatpush3.msra.mxu0 %v368_v17  ;;  %1026 = vmatpush3.msra.mxu1 %v368_v17 }
  0x7c   : > { %982 = vmatprep.subr.mxu0 %v383_v18  ;;  %1011 = vmatprep.subr.mxu1 %v383_v18 }
  0x7d   : > { %983 = vmatpush3.msra.mxu0 %v367_v19  ;;  %1027 = vmatpush3.msra.mxu1 %v367_v19 }
  0x7e   : > { %984 = vmatprep.subr.mxu0 %v382_v20  ;;  %1012 = vmatprep.subr.mxu1 %v382_v20 }
  0x7f   : > { %985 = vmatpush3.msra.mxu0 %v366_v21  ;;  %1028 = vmatpush3.msra.mxu1 %v366_v21 }
  0x80   : > { %986 = vmatprep.subr.mxu0 %v381_v22  ;;  %1013 = vmatprep.subr.mxu1 %v381_v22 }
  0x81   : > { %987 = vmatpush3.msra.mxu0 %v365_v23  ;;  %1029 = vmatpush3.msra.mxu1 %v365_v23 }
  0x82   : > { %988 = vmatprep.subr.mxu0 %v380_v24  ;;  %1014 = vmatprep.subr.mxu1 %v380_v24 }
  0x83   : > { %989 = vmatpush3.msra.mxu0 %v364_v25  ;;  %1030 = vmatpush3.msra.mxu1 %v364_v25 }
  0x84   : > { %990 = vmatprep.subr.mxu0 %v379_v26  ;;  %1015 = vmatprep.subr.mxu1 %v379_v26 }
  0x85   : > { %991 = vmatpush3.msra.mxu0 %v363_v27  ;;  %1031 = vmatpush3.msra.mxu1 %v363_v27 }
  0x86   : > { %992 = vmatprep.subr.mxu0 %v378_v28  ;;  %1016 = vmatprep.subr.mxu1 %v378_v28 }
  0x87   : > { %993 = vmatpush3.msra.mxu0 %v362_v29  ;;  %1032 = vmatpush3.msra.mxu1 %v362_v29 }
  0x88   : > { %994 = vmatprep.subr.mxu0 %v377_v30  ;;  %1017 = vmatprep.subr.mxu1 %v377_v30 }
  0x89   : > { %995 = vmatpush3.msra.mxu0 %v361_v31  ;;  %1033 = vmatpush3.msra.mxu1 %v361_v31 }
  0x8a   : > { %459 = vmatprep.mubr.f32.mxu0 %v358_v32  ;;  %464 = vmatprep.mubr.f32.mxu1 %v360_v33 }
  0x8b   : > { %460 = vmatmul.mubr.f32.vlgmr.msra.gmra.mxu0 %v357_v34  ;;  %465 = vmatmul.mubr.f32.vlgmr.msra.gmra.mxu1 %v359_v35 }
 0x14b   : > { %v996_v37 = vpop.f32.mrf.mxu0  ;;  %v999_v38 = vpop.f32.mrf.mxu1 }
 0x14d   : > { %v997_v40 = vpop.f32.mrf.mxu0  ;;  %v1000_v42 = vpop.f32.mrf.mxu1 }
 0x14e   : > { %v998_v43 = vadd.f32 %v997_v40, %v996_v37  ;;  %v1001_v44 = vadd.f32 %v1000_v42, %v999_v38 }
 0x150   : > { %v462_v45 = vadd.f32 %v998_v43, %v393_v39  ;;  %v467_v46 = vadd.f32 %v1001_v44, %v394_v41 }
 0x152   : > { %470 = vst [vmem:[#allocation10] sm:$0xff] %v462_v45  ;;  %471 = vst [vmem:[#allocation10 + $0x10] sm:$0xff] %v467_v46 }
 0x153 PF: > { %p950_p5 = scmp.le.s32.totalorder %s1388_s28, 0 }
 0x154   : > { %s955_s14 = sadd.s32 (!%p950_p5), 4294967295, %s1388_s28 }
 0x155   : > { %475 = sbr.rel (%p950_p5) target bundleno = 801 (0x321), region = 72  ;;  %s956_s30 = sshll.u32 (!%p950_p5), %s955_s14, 3 }
 0x15a   : > { %v486_v47 = vld [vmem:[#allocation10 + $0x48] sm:$0xff]  ;;  %v485_v48 = vld [vmem:[#allocation10 + $0x40] sm:$0xff]  ;;  %v484_v49 = vld [vmem:[#allocation10 + $0x38] sm:$0xff]  ;;  %v1324_v51 = vmov 0.0   ;;  %v1325_v53 = vmov 0   ;;  %vm487_vm0 = vcmask 326656  }
 0x15b   : > { %513 = vmatprep.subr.mxu0 %v486_v47  ;;  %v483_v50 = vld [vmem:[#allocation10 + $0x30] sm:$0xff]  ;;  %555 = vmatprep.mubr.f32.mxu0 %v1324_v51  ;;  %v482_v52 = vld [vmem:[#allocation10 + $0x28] sm:$0xff]  ;;  %v481_v54 = vld [vmem:[#allocation10 + $0x20] sm:$0xff] }
 0x15c   : > { %514 = vmatpush1.msra.mxu0 %v485_v48  ;;  %1120 = vset.pattern.permute.xlu0 %v1325_v53  ;;  %v562_v55 = vld [vmem:[%s1500_s27] sm:$0xff]  ;;  %v480_v56 = vld [vmem:[#allocation10 + $0x18] sm:$0xff]  ;;  %v629_v58 = vld [vmem:[#allocation7 + $0x1e0] sm:$0xff] }
 0x15d   : > { %515 = vmatprep.subr.mxu0 %v484_v49  ;;  %719 = vmatprep.mubr.f32.mxu1 %v1324_v51  ;;  %v630_v57 = vld [vmem:[#allocation7 + $0x1e8] sm:$0xff]  ;;  %v479_v59 = vld [vmem:[#allocation10 + $0x10] sm:$0xff]  ;;  %v478_v61 = vld [vmem:[#allocation10 + $0x8] sm:$0xff] }
 0x15e   : > { %516 = vmatpush1.msra.mxu0 %v483_v50  ;;  %565 = vperm.xlu0 %1120, %v562_v55   ;;  %v626_v60 = vld [vmem:[#allocation7 + $0x1c8] sm:$0xff]  ;;  %v625_v62 = vld [vmem:[#allocation7 + $0x1c0] sm:$0xff]  ;;  %v477_v0 = vld [vmem:[#allocation10] sm:$0xff] }
 0x15f   : > { %517 = vmatprep.subr.mxu0 %v482_v52  ;;  %655 = vmatprep.subr.mxu1 %v630_v57  ;;  %v622_v63 = vld [vmem:[#allocation7 + $0x1a8] sm:$0xff]  ;;  %v621_v1 = vld [vmem:[#allocation7 + $0x1a0] sm:$0xff]  ;;  %v632_v3 = vld [vmem:[#allocation7 + $0x1f8] sm:$0xff] }
 0x160   : > { %518 = vmatpush1.msra.mxu0 %v481_v54  ;;  %656 = vmatpush1.msra.mxu1 %v629_v58  ;;  %v476_v2 = vld [vmem:[%s309_s21] sm:$0xff]  ;;  %v631_v4 = vld [vmem:[#allocation7 + $0x1f0] sm:$0xff]  ;;  %v628_v6 = vld [vmem:[#allocation7 + $0x1d8] sm:$0xff]  ;;  %s823_s21 = sadd.s32 16, %s956_s30 }
 0x161   : > { %519 = vmatprep.subr.mxu0 %v480_v56  ;;  %657 = vmatprep.subr.mxu1 %v626_v60  ;;  %v618_v5 = vld [vmem:[#allocation7 + $0x188] sm:$0xff]  ;;  %v617_v7 = vld [vmem:[#allocation7 + $0x180] sm:$0xff]  ;;  %v627_v8 = vld [vmem:[#allocation7 + $0x1d0] sm:$0xff]  ;;  %s824_s22 = sshra.s32 %s823_s21, 3 }
 0x162   : > { %520 = vmatpush1.msra.mxu0 %v479_v59  ;;  %658 = vmatpush1.msra.mxu1 %v625_v62  ;;  %v614_v9 = vld [vmem:[#allocation7 + $0x168] sm:$0xff]  ;;  %v624_v10 = vld [vmem:[#allocation7 + $0x1b8] sm:$0xff]  ;;  %v613_v11 = vld [vmem:[#allocation7 + $0x160] sm:$0xff]  ;;  %s963_s23 = sshll.u32 %s824_s22, 4 }
 0x163   : > { %521 = vmatprep.subr.mxu0 %v478_v61  ;;  %659 = vmatprep.subr.mxu1 %v622_v63  ;;  %v623_v12 = vld [vmem:[#allocation7 + $0x1b0] sm:$0xff]  ;;  %v610_v13 = vld [vmem:[#allocation7 + $0x148] sm:$0xff]  ;;  %v620_v14 = vld [vmem:[#allocation7 + $0x198] sm:$0xff]  ;;  %s828_s24 = scalar_lea.vmem [#allocation10], %s963_s23 }
 0x164   : > { %522 = vmatpush1.msra.mxu0 %v477_v0  ;;  %660 = vmatpush1.msra.mxu1 %v621_v1  ;;  %v609_v15 = vld [vmem:[#allocation7 + $0x140] sm:$0xff]  ;;  %v619_v16 = vld [vmem:[#allocation7 + $0x190] sm:$0xff]  ;;  %v606_v17 = vld [vmem:[#allocation7 + $0x128] sm:$0xff]  ;;  %v635_v1 = vlaneseq }
 0x165   : > { %951 = vmatmul.mubr.msk.f32.vlgmr.msra.gmra.mxu0 %vm487_vm0, %v476_v2  ;;  %726 = vmatprep.subr.mxu0 %v632_v3  ;;  %v616_v18 = vld [vmem:[#allocation7 + $0x178] sm:$0xff]  ;;  %v605_v19 = vld [vmem:[#allocation7 + $0x120] sm:$0xff]  ;;  %v615_v20 = vld [vmem:[#allocation7 + $0x170] sm:$0xff] }
 0x166   : > { %727 = vmatpush1.msra.mxu0 %v631_v4  ;;  %661 = vmatprep.subr.mxu1 %v618_v5  ;;  %v602_v21 = vld [vmem:[#allocation7 + $0x108] sm:$0xff]  ;;  %v612_v22 = vld [vmem:[#allocation7 + $0x158] sm:$0xff]  ;;  %v601_v23 = vld [vmem:[#allocation7 + $0x100] sm:$0xff] }
 0x167   : > { %728 = vmatprep.subr.mxu0 %v628_v6  ;;  %662 = vmatpush1.msra.mxu1 %v617_v7  ;;  %v611_v24 = vld [vmem:[#allocation7 + $0x150] sm:$0xff]  ;;  %v598_v25 = vld [vmem:[#allocation7 + $0xe8] sm:$0xff]  ;;  %v608_v26 = vld [vmem:[#allocation7 + $0x138] sm:$0xff] }
 0x168   : > { %729 = vmatpush1.msra.mxu0 %v627_v8  ;;  %663 = vmatprep.subr.mxu1 %v614_v9  ;;  %v597_v27 = vld [vmem:[#allocation7 + $0xe0] sm:$0xff]  ;;  %v607_v28 = vld [vmem:[#allocation7 + $0x130] sm:$0xff]  ;;  %v594_v29 = vld [vmem:[#allocation7 + $0xc8] sm:$0xff] }
 0x169   : > { %730 = vmatprep.subr.mxu0 %v624_v10  ;;  %664 = vmatpush1.msra.mxu1 %v613_v11  ;;  %v604_v30 = vld [vmem:[#allocation7 + $0x118] sm:$0xff]  ;;  %v593_v31 = vld [vmem:[#allocation7 + $0xc0] sm:$0xff]  ;;  %v603_v32 = vld [vmem:[#allocation7 + $0x110] sm:$0xff] }
 0x16a   : > { %731 = vmatpush1.msra.mxu0 %v623_v12  ;;  %665 = vmatprep.subr.mxu1 %v610_v13  ;;  %v590_v33 = vld [vmem:[#allocation7 + $0xa8] sm:$0xff]  ;;  %v600_v34 = vld [vmem:[#allocation7 + $0xf8] sm:$0xff]  ;;  %v589_v35 = vld [vmem:[#allocation7 + $0xa0] sm:$0xff] }
 0x16b   : > { %732 = vmatprep.subr.mxu0 %v620_v14  ;;  %666 = vmatpush1.msra.mxu1 %v609_v15  ;;  %v599_v36 = vld [vmem:[#allocation7 + $0xf0] sm:$0xff]  ;;  %v586_v37 = vld [vmem:[#allocation7 + $0x88] sm:$0xff]  ;;  %v596_v38 = vld [vmem:[#allocation7 + $0xd8] sm:$0xff] }
 0x16c   : > { %733 = vmatpush1.msra.mxu0 %v619_v16  ;;  %667 = vmatprep.subr.mxu1 %v606_v17  ;;  %v585_v39 = vld [vmem:[#allocation7 + $0x80] sm:$0xff]  ;;  %v595_v40 = vld [vmem:[#allocation7 + $0xd0] sm:$0xff]  ;;  %v582_v41 = vld [vmem:[#allocation7 + $0x68] sm:$0xff] }
 0x16d   : > { %734 = vmatprep.subr.mxu0 %v616_v18  ;;  %668 = vmatpush1.msra.mxu1 %v605_v19  ;;  %v592_v42 = vld [vmem:[#allocation7 + $0xb8] sm:$0xff]  ;;  %v581_v43 = vld [vmem:[#allocation7 + $0x60] sm:$0xff]  ;;  %v591_v44 = vld [vmem:[#allocation7 + $0xb0] sm:$0xff] }
 0x16e   : > { %735 = vmatpush1.msra.mxu0 %v615_v20  ;;  %669 = vmatprep.subr.mxu1 %v602_v21  ;;  %v578_v45 = vld [vmem:[#allocation7 + $0x48] sm:$0xff]  ;;  %v588_v46 = vld [vmem:[#allocation7 + $0x98] sm:$0xff]  ;;  %v577_v47 = vld [vmem:[#allocation7 + $0x40] sm:$0xff] }
 0x16f   : > { %736 = vmatprep.subr.mxu0 %v612_v22  ;;  %670 = vmatpush1.msra.mxu1 %v601_v23  ;;  %v587_v48 = vld [vmem:[#allocation7 + $0x90] sm:$0xff]  ;;  %v574_v49 = vld [vmem:[#allocation7 + $0x28] sm:$0xff]  ;;  %v584_v50 = vld [vmem:[#allocation7 + $0x78] sm:$0xff] }
 0x170   : > { %737 = vmatpush1.msra.mxu0 %v611_v24  ;;  %671 = vmatprep.subr.mxu1 %v598_v25  ;;  %v573_v52 = vld [vmem:[#allocation7 + $0x20] sm:$0xff]  ;;  %v583_v53 = vld [vmem:[#allocation7 + $0x70] sm:$0xff]  ;;  %v580_v54 = vld [vmem:[#allocation7 + $0x58] sm:$0xff] }
 0x171   : > { %738 = vmatprep.subr.mxu0 %v608_v26  ;;  %672 = vmatpush1.msra.mxu1 %v597_v27  ;;  %v579_v55 = vld [vmem:[#allocation7 + $0x50] sm:$0xff]  ;;  %v576_v56 = vld [vmem:[#allocation7 + $0x38] sm:$0xff]  ;;  %v570_v58 = vld [vmem:[#allocation7 + $0x8] sm:$0xff] }
 0x172   : > { %739 = vmatpush1.msra.mxu0 %v607_v28  ;;  %673 = vmatprep.subr.mxu1 %v594_v29  ;;  %v575_v57 = vld [vmem:[#allocation7 + $0x30] sm:$0xff]  ;;  %v572_v59 = vld [vmem:[#allocation7 + $0x18] sm:$0xff]  ;;  %v569_v60 = vld [vmem:[#allocation7] sm:$0xff] }
 0x173   : > { %740 = vmatprep.subr.mxu0 %v604_v30  ;;  %674 = vmatpush1.msra.mxu1 %v593_v31  ;;  %v571_v61 = vld [vmem:[#allocation7 + $0x10] sm:$0xff] }
 0x174   : > { %741 = vmatpush1.msra.mxu0 %v603_v32  ;;  %675 = vmatprep.subr.mxu1 %v590_v33  ;;  %v633_v4 = vld [vmem:[%s1556_s4] sm:$0xf] }
 0x175   : > { %742 = vmatprep.subr.mxu0 %v600_v34  ;;  %676 = vmatpush1.msra.mxu1 %v589_v35 }
 0x176   : > { %743 = vmatpush1.msra.mxu0 %v599_v36  ;;  %677 = vmatprep.subr.mxu1 %v586_v37 }
 0x177   : > { %744 = vmatprep.subr.mxu0 %v596_v38  ;;  %678 = vmatpush1.msra.mxu1 %v585_v39 }
 0x178   : > { %745 = vmatpush1.msra.mxu0 %v595_v40  ;;  %679 = vmatprep.subr.mxu1 %v582_v41 }
 0x179   : > { %746 = vmatprep.subr.mxu0 %v592_v42  ;;  %680 = vmatpush1.msra.mxu1 %v581_v43 }
 0x17a   : > { %747 = vmatpush1.msra.mxu0 %v591_v44  ;;  %681 = vmatprep.subr.mxu1 %v578_v45 }
 0x17b   : > { %748 = vmatprep.subr.mxu0 %v588_v46  ;;  %682 = vmatpush1.msra.mxu1 %v577_v47 }
 0x17c   : > { %749 = vmatpush1.msra.mxu0 %v587_v48  ;;  %683 = vmatprep.subr.mxu1 %v574_v49 }
 0x17d   : > { %750 = vmatprep.subr.mxu0 %v584_v50  ;;  %684 = vmatpush1.msra.mxu1 %v573_v52 }
 0x17e   : > { %751 = vmatpush1.msra.mxu0 %v583_v53  ;;  %790 = vmatprep.mubr.f32.mxu0 %v1324_v51  ;;  %v636_v51 = vshrl.u32 %v635_v1, 7 }
 0x17f   : > { %752 = vmatprep.subr.mxu0 %v580_v54  ;;  %685 = vmatprep.subr.mxu1 %v570_v58 }
 0x180   : > { %753 = vmatpush1.msra.mxu0 %v579_v55  ;;  %686 = vmatpush1.msra.mxu1 %v569_v60  ;;  %v637_v2 = vsub.s32 0, %v636_v51  ;;  %v645_v3 = vsub.s32 2, %v636_v51  ;;  %v641_v14 = vsub.s32 1, %v636_v51  ;;  %v649_v17 = vsub.s32 3, %v636_v51 }
 0x181   : > { %754 = vmatprep.subr.mxu0 %v576_v56 }
 0x182   : > { %755 = vmatpush1.msra.mxu0 %v575_v57  ;;  %v638_v5 = vrot.slane %v633_v4, %v637_v2  ;;  %v646_v6 = vrot.slane %v633_v4, %v645_v3  ;;  %v642_v15 = vrot.slane %v633_v4, %v641_v14  ;;  %v650_v19 = vrot.slane %v633_v4, %v649_v17 }
 0x183   : > { %756 = vmatprep.subr.mxu0 %v572_v59 }
 0x184   : > { %757 = vmatpush1.msra.mxu0 %v571_v61 }
 0x1d9   : > { %v566_v62 = vpop.permute.xlu0 %565 }
 0x225   : > { %v557_v63 = vpop.f32.mrf.mxu0 }
 0x226   : > { %v568_v0 = vmul.f32 %v566_v62, %v557_v63 }
 0x227   : > { %v559_v7 = vpop.f32.mrf.mxu0 }
 0x228   : > { %720 = vmatmul.mubr.f32.vlgmr.msra.gmra.mxu1 %v568_v0  ;;  %791 = vmatmul.mubr.f32.vlgmr.msra.gmra.mxu0 %v568_v0 }
 0x2e8   : > { %v721_v8 = vpop.f32.mrf.mxu1  ;;  %v792_v9 = vpop.f32.mrf.mxu0 }
 0x2e9   : > { %v722_v10 = vadd.f32 %v721_v8, %v638_v5  ;;  %v793_v11 = vadd.f32 %v792_v9, %v646_v6 }
 0x2ea   : > { %v723_v16 = vpop.f32.mrf.mxu1  ;;  %v794_v20 = vpop.f32.mrf.mxu0 }
 0x2eb   : > { %v952_v12 = vmul.f32 -1.442695, %v722_v10  ;;  %v954_v13 = vmul.f32 -1.442695, %v793_v11  ;;  %v724_v18 = vadd.f32 %v723_v16, %v642_v15  ;;  %v795_v22 = vadd.f32 %v794_v20, %v650_v19 }
 0x2ed   : > { %1121 = vpow2.f32 %v952_v12  ;;  %v953_v21 = vmul.f32 -1.442695, %v724_v18 }
 0x2ee   : > { %1123 = vpow2.f32 %v954_v13 }
 0x2ef   : > { %1125 = vpow2.f32 %v953_v21 }
 0x2f0   : > { %1127 = vtanh.f32 %v795_v22 }
 0x2fa   : > { %v1122_v23 = vpop.eup %1121 }
 0x2fb   : > { %v1124_v24 = vpop.eup %1123  ;;  %v806_v25 = vadd.f32 1.0, %v1122_v23 }
 0x2fc   : > { %v808_v26 = vadd.f32 1.0, %v1124_v24  ;;  %v1126_v27 = vpop.eup %1125 }
 0x2fd   : > { %1129 = vrcp.f32 %v806_v25  ;;  %v1128_v28 = vpop.eup %1127  ;;  %v807_v31 = vadd.f32 1.0, %v1126_v27 }
 0x2fe   : > { %1131 = vrcp.f32 %v808_v26 }
 0x2ff   : > { %1133 = vrcp.f32 %v807_v31 }
 0x30a   : > { %v1130_v29 = vpop.eup %1129 }
 0x30b   : > { %v1132_v30 = vpop.eup %1131  ;;  %v816_v32 = vmul.f32 %v1130_v29, %v1128_v28 }
 0x30c   : > { %v817_v33 = vmul.f32 %v1132_v30, %v559_v7  ;;  %v1134_v35 = vpop.eup %1133 }
 0x30e   : > { %v818_v34 = vadd.f32 %v817_v33, %v816_v32 }
 0x310   : > { %1135 = vtanh.f32 %v818_v34  ;;  %830 = vst [vmem:[%s828_s24 + $0x8] sm:$0xff] %v818_v34 }
 0x31d   : > { %v1136_v36 = vpop.eup %1135 }
 0x31e   : > { %v820_v37 = vmul.f32 %v1136_v36, %v1134_v35 }
 0x320   : > { %829 = vst [vmem:[%s828_s24] sm:$0xff] %v820_v37 }
 0x321 PF: > { %p1073_p9 = scmp.eq.s32.totalorder %s1388_s28, 3  ;;  %s1326_s8 = smov [#allocation10]  }
 0x322   : > { %s837_s27 = sshll.u32 %s1326_s8, 4  ;;  %s838_s27 = int_to_ptr.vmem [resolvable:$true] %s837_s27 }
 0x323   : > { %s1243_s29 = scalar_lea.vmem %s838_s27, 1280  ;;  %p1250_p2 = scmp.lt.s32.totalorder %s838_s27, %s838_s27 }
 0x324   : > { %p1244_p11 = scmp.ne.s32.totalorder %s838_s27, %s1243_s29  ;;  %p1251_p3 = scmp.lt.s32.totalorder %s1243_s29, %s1243_s29 }
 0x326   : > { %p1245_p13 = pnand %p1244_p11, %p1073_p9  ;;  %p1252_p7 = por %p1251_p3, %p1250_p2 }
 0x328   : > { %p1246_p12 = pneg %p1245_p13 }
 0x32a   : > { %p1253_p0 = pnand %p1252_p7, %p1246_p12 }
 0x32c   : > { %1256 = shalt.err (!%p1253_p0)
}
 0x32d   : > { %s1327_s9 = smov 256   ;;  %s1328_s11 = smov 16  }
 0x32e   : > { %1049 = dma.vmem_to_hbm [thread:$0]  (%p1073_p9), %s838_s27, 1280, %s1559_s7, [#allocation4], %s1327_s9, %s1327_s9, %s1328_s11  }
 0x32f   : > { %1296 = dma.done.wait (%p1073_p9), [#allocation4], 1280  }
 0x330   : > { %1298 = vsyncadd (%p1073_p9), [#allocation4], 4294966016 }
 0x331 PF: > { %p20_p10 = scmp.ge.s32.totalorder %s1440_s12, 6   ;;  %s1574_s24 = smov %s1305_s25 }
 0x332   : > { %s1575_s25 = smov %s1309_s26  ;;  %s1576_s26 = smov %s1450_s16 }
 0x333   : > { %s1577_s27 = smov %s1440_s12  ;;  %22 = sbr.rel (!%p20_p10) target bundleno = 6 (0x6), region = 110 }
 0x338   :  { %853 = vsyncpa [#allocation3], 1 }
 0x339   :  { %855 = vsyncpa [#allocation3 + $0x1], 1 }
 0x33a   :  { %856 = vsyncpa [#allocation6], 1 }
 0x33b   :  { %857 = vsyncpa [#allocation9], 1 }
 0x33c   :  { %859 = vsyncpa [#allocation9 + $0x1], 1 }
 0x33d   :  { %860 = vsyncpa [#allocation4], 1 }
 0x33e   :  { %862 = vsyncpa [#allocation4 + $0x1], 1 }

</bundles_post_ra>
